<compile_context>
chip_gen: v7x
topology: tpu7x:2x2x1
jax: 0.10.0
libtpu: 0.0.40
codegen_flags: <defaults>
</compile_context>

<pallas_src>
import functools

import jax
import jax.numpy as jnp
from jax.experimental import pallas as pl
from jax.experimental.pallas import tpu as pltpu

# Matches the torch module's forward() default (ConvNeXt-V2 variants use 1e-6).
DEFAULT_EPS = 1e-5

_LANE = 128
_CHUNK_ROWS = 512  # in-kernel row chunk; multiple of 8/16/32 -> fits all dtypes


def _round_up(a, b):
    return ((a + b - 1) // b) * b


def _sublane_mult(dtype):
    # Native sublane packing: 8 rows for 4-byte, 16 for bf16, 32 for int8/fp8.
    return max(8, 32 // jnp.dtype(dtype).itemsize)


def _block_vmem_bytes(rows, cols, dtype):
    """VMEM footprint of a (rows, cols) tile after (sublane, lane) padding."""
    eb = jnp.dtype(dtype).itemsize
    return _round_up(max(rows, 1), _sublane_mult(dtype)) * _round_up(cols, _LANE) * eb


def _physical_vmem_bytes():
    """Physical VMEM of the local chip (fallback: v7x worst case, 64 MiB)."""
    try:
        info = pltpu.get_tpu_info()
        cap = getattr(info, "vmem_capacity_bytes", None)
        if cap:
            return int(cap)
    except Exception:
        pass
    return 64 * 1024 * 1024


def _num_tensorcores():
    """Best-effort TensorCore count (v7x = 2); defaults to 1 if unknown."""
    try:
        info = pltpu.get_tpu_info()
        for name in ("num_tensorcores", "tensorcore_count", "num_cores", "core_count"):
            v = getattr(info, name, None)
            if v:
                return int(v)
    except Exception:
        pass
    return 1


def _vmem_limit(need_bytes, cap):
    """Explicit scoped-VMEM limit: working set + headroom, clamped below cap."""
    return int(min(max(int(need_bytes * 1.25), 32 * 1024 * 1024), int(cap * 0.9)))


def _fast_recip(d):
    # EUP approximate reciprocal + one Newton step: divide stays off the VALU
    # (EUP slot is otherwise idle) while restoring ~f32 accuracy; operand is a
    # tiny (1, 1) vector so this is effectively free.
    r = pl.reciprocal(d, approx=True)
    return r * (2.0 - d * r)


# ---------------------------------------------------------------------------
# Shared in-kernel math (all f32; operands are 2-D (rows, C) refs/arrays)
# ---------------------------------------------------------------------------

def _scale_from_ssq(ssq, gamma, *, eps):
    """scale = gamma * Nx + 1 so that out = x*scale + beta.  ssq/gamma: (1, C)."""
    gx = jnp.sqrt(ssq)                                   # per-channel L2 norm
    gx_mean = jnp.mean(gx, axis=-1, keepdims=True)       # mean over the real C
    nx = gx * _fast_recip(gx_mean + eps)
    return gamma.astype(jnp.float32) * nx + 1.0


def _chunked_ssq(x_ref, *, chunk):
    """Per-channel sum of squares over the rows of a (S, C) ref -> (1, C) f32.

    Chunked so the f32 temporaries stay chunk-sized even for whole-image refs.
    """
    S, C = x_ref.shape

    def _ss(rows):
        xf = rows.astype(jnp.float32)
        return jnp.sum(xf * xf, axis=0, keepdims=True)

    if S <= chunk:
        return _ss(x_ref[...])

    n_full, rem = divmod(S, chunk)

    def body(i, acc):
        start = pl.multiple_of(i * chunk, chunk)
        return acc + _ss(x_ref[pl.ds(start, chunk), :])

    acc = jax.lax.fori_loop(0, n_full, body, jnp.zeros((1, C), jnp.float32))
    if rem:
        acc = acc + _ss(x_ref[pl.ds(n_full * chunk, rem), :])
    return acc


def _chunked_apply(x_ref, o_ref, scale, beta, *, chunk):
    """o = x * scale + beta, f32 math, single cast at the store, chunked rows."""
    S, _ = x_ref.shape

    def _apply(rows):
        return (rows.astype(jnp.float32) * scale + beta).astype(o_ref.dtype)

    if S <= chunk:
        o_ref[...] = _apply(x_ref[...])
        return

    n_full, rem = divmod(S, chunk)

    def body(i, carry):
        start = pl.multiple_of(i * chunk, chunk)
        o_ref[pl.ds(start, chunk), :] = _apply(x_ref[pl.ds(start, chunk), :])
        return carry

    jax.lax.fori_loop(0, n_full, body, 0)
    if rem:
        s0 = n_full * chunk
        o_ref[pl.ds(s0, rem), :] = _apply(x_ref[pl.ds(s0, rem), :])


# ---------------------------------------------------------------------------
# Kernels
# ---------------------------------------------------------------------------

def _grn_single_kernel(gamma_ref, beta_ref, x_ref, o_ref, *, eps, chunk):
    """Whole (S, C) image resident (auto-pipelined): reduce + apply in one pass."""
    ssq = _chunked_ssq(x_ref, chunk=chunk)                        # (1, C) f32
    scale = _scale_from_ssq(ssq, gamma_ref[...], eps=eps)
    _chunked_apply(x_ref, o_ref, scale, beta_ref[...], chunk=chunk)


def _grn_manual_kernel(gamma_ref, beta_ref, x_hbm, o_hbm, buf, sem, *, eps, chunk):
    """Single-buffered whole image: manual DMA in, in-place apply, DMA out."""
    b = pl.program_id(0)
    cp_in = pltpu.make_async_copy(x_hbm.at[b], buf, sem)
    cp_in.start()
    cp_in.wait()
    ssq = _chunked_ssq(buf, chunk=chunk)
    scale = _scale_from_ssq(ssq, gamma_ref[...], eps=eps)
    _chunked_apply(buf, buf, scale, beta_ref[...], chunk=chunk)   # in place
    cp_out = pltpu.make_async_copy(buf, o_hbm.at[b], sem)
    cp_out.start()
    cp_out.wait()


def _grn_ssq_kernel(x_ref, ssq_ref, *, s_total, st, tiles_per_split, need_mask):
    """Pass 1: per-(batch, split, channel) sum of squares over spatial tiles."""
    j = pl.program_id(2)

    @pl.when(j == 0)
    def _():
        ssq_ref[...] = jnp.zeros_like(ssq_ref)

    xf = x_ref[...].astype(jnp.float32)                           # (St, C)
    if need_mask:
        # The last spatial tile may overrun S (no HBM padding any more):
        # out-of-range rows contain unspecified data, mask them to zero.
        split = pl.program_id(1)
        row0 = (split * tiles_per_split + j) * st
        rows = row0 + jax.lax.broadcasted_iota(jnp.int32, (st, 1), 0)
        xf = jnp.where(rows < s_total, xf, 0.0)
    ssq_ref[...] += jnp.sum(xf * xf, axis=0, keepdims=True)


def _grn_apply_kernel(ssq_ref, gamma_ref, beta_ref, x_ref, o_ref, *, eps):
    """Pass 2: fully parallel elementwise apply over (batch, spatial tiles).

    Garbage rows of a ragged last tile produce garbage outputs whose HBM
    write-back is dropped by Pallas (out-of-bounds block writes are discarded).
    """
    scale = _scale_from_ssq(ssq_ref[...], gamma_ref[...], eps=eps)
    o_ref[...] = (x_ref[...].astype(jnp.float32) * scale
                  + beta_ref[...]).astype(o_ref.dtype)


# ---------------------------------------------------------------------------
# Execution plans
# ---------------------------------------------------------------------------

def _single_pass(x3, g2, b2, *, eps, cap):
    B, S, C = x3.shape
    eb = jnp.dtype(x3.dtype).itemsize
    need = (4 * _block_vmem_bytes(S, C, x3.dtype)
            + 2 * _block_vmem_bytes(min(_CHUNK_ROWS, S), C, jnp.float32)
            + (1 << 20))
    kernel = functools.partial(_grn_single_kernel, eps=eps, chunk=_CHUNK_ROWS)
    return pl.pallas_call(
        kernel,
        out_shape=jax.ShapeDtypeStruct((B, S, C), x3.dtype),
        grid=(B,),
        in_specs=[
            pl.BlockSpec((1, C), lambda b: (0, 0)),              # gamma
            pl.BlockSpec((1, C), lambda b: (0, 0)),              # beta
            pl.BlockSpec((None, S, C), lambda b: (b, 0, 0)),     # x (full image)
        ],
        out_specs=pl.BlockSpec((None, S, C), lambda b: (b, 0, 0)),
        compiler_params=pltpu.CompilerParams(
            dimension_semantics=("parallel",),
            vmem_limit_bytes=_vmem_limit(need, cap)),
        cost_estimate=pl.CostEstimate(
            flops=5 * B * S * C, transcendentals=B * C,
            bytes_accessed=2 * B * S * C * eb),
    )(g2, b2, x3)


def _manual_single_pass(x3, g2, b2, *, eps, cap):
    B, S, C = x3.shape
    eb = jnp.dtype(x3.dtype).itemsize
    need = (_block_vmem_bytes(S, C, x3.dtype)
            + 2 * _block_vmem_bytes(min(_CHUNK_ROWS, S), C, jnp.float32)
            + (1 << 20))
    kernel = functools.partial(_grn_manual_kernel, eps=eps, chunk=_CHUNK_ROWS)
    return pl.pallas_call(
        kernel,
        out_shape=jax.ShapeDtypeStruct((B, S, C), x3.dtype),
        grid=(B,),
        in_specs=[
            pl.BlockSpec((1, C), lambda b: (0, 0)),              # gamma
            pl.BlockSpec((1, C), lambda b: (0, 0)),              # beta
            pl.BlockSpec(memory_space=pl.ANY),                   # x stays in HBM
        ],
        out_specs=pl.BlockSpec(memory_space=pl.ANY),
        scratch_shapes=[pltpu.VMEM((S, C), x3.dtype),            # whole image
                        pltpu.SemaphoreType.DMA],
        compiler_params=pltpu.CompilerParams(
            dimension_semantics=("parallel",),
            vmem_limit_bytes=_vmem_limit(need, cap)),
        cost_estimate=pl.CostEstimate(
            flops=5 * B * S * C, transcendentals=B * C,
            bytes_accessed=2 * B * S * C * eb),
    )(g2, b2, x3)


def _two_pass(x3, g2, b2, *, eps, cap, spatial_tile):
    B, S, C = x3.shape
    eb = jnp.dtype(x3.dtype).itemsize
    sub = _sublane_mult(x3.dtype)

    # Cap the spatial tile (~1024 rows already hits the HBM roofline) so DMA /
    # compute overlap is preserved and there are plenty of tiles to shard.
    st = 1024 if spatial_tile is None else max(1, int(spatial_tile))
    st = _round_up(st, sub)
    if st >= S:
        st = S                      # single tile == full dim (always legal)
    n_tiles = pl.cdiv(S, st)

    # Split the reduction into two independent "parallel" halves so both v7x
    # TensorCores stream HBM even at batch 1 (a free no-op on 1-core chips);
    # partials are combined with a tiny jnp sum outside the kernel.
    n_split = 2 if (n_tiles >= 4 and n_tiles % 2 == 0) else 1
    tps = n_tiles // n_split
    need_mask = (S % st) != 0

    # ---- Pass 1: per-channel sum of squares (reduction axis last). ----
    ssq_kernel = functools.partial(_grn_ssq_kernel, s_total=S, st=st,
                                   tiles_per_split=tps, need_mask=need_mask)
    p1_need = (2 * _block_vmem_bytes(st, C, x3.dtype)
               + _block_vmem_bytes(st, C, jnp.float32)
               + 4 * _round_up(C, _LANE) * 4 + (1 << 20))
    ssq_parts = pl.pallas_call(
        ssq_kernel,
        out_shape=jax.ShapeDtypeStruct((B, n_split, 1, C), jnp.float32),
        grid=(B, n_split, tps),
        in_specs=[pl.BlockSpec((None, st, C),
                               lambda b, s, j: (b, s * tps + j, 0))],
        out_specs=pl.BlockSpec((None, None, 1, C),
                               lambda b, s, j: (b, s, 0, 0)),
        compiler_params=pltpu.CompilerParams(
            dimension_semantics=("parallel", "parallel", "arbitrary"),
            vmem_limit_bytes=_vmem_limit(p1_need, cap)),
        cost_estimate=pl.CostEstimate(
            flops=2 * B * S * C, transcendentals=0,
            bytes_accessed=B * S * C * eb + B * n_split * C * 4),
    )(x3)

    ssq = ssq_parts.sum(axis=1)                   # (B, 1, C): tiny combine

    # ---- Pass 2: elementwise apply, parallel over batch AND spatial tiles. ----
    apply_kernel = functools.partial(_grn_apply_kernel, eps=eps)
    p2_need = (4 * _block_vmem_bytes(st, C, x3.dtype)
               + _block_vmem_bytes(st, C, jnp.float32)
               + 8 * _round_up(C, _LANE) * 4 + (1 << 20))
    return pl.pallas_call(
        apply_kernel,
        out_shape=jax.ShapeDtypeStruct((B, S, C), x3.dtype),
        grid=(B, n_tiles),
        in_specs=[
            pl.BlockSpec((None, 1, C), lambda b, j: (b, 0, 0)),   # ssq
            pl.BlockSpec((1, C), lambda b, j: (0, 0)),            # gamma
            pl.BlockSpec((1, C), lambda b, j: (0, 0)),            # beta
            pl.BlockSpec((None, st, C), lambda b, j: (b, j, 0)),  # x
        ],
        out_specs=pl.BlockSpec((None, st, C), lambda b, j: (b, j, 0)),
        compiler_params=pltpu.CompilerParams(
            dimension_semantics=("parallel", "parallel"),
            vmem_limit_bytes=_vmem_limit(p2_need, cap)),
        cost_estimate=pl.CostEstimate(
            flops=3 * B * S * C, transcendentals=B * C,
            bytes_accessed=2 * B * S * C * eb + B * C * 4),
    )(ssq, g2, b2, x3)


# ---------------------------------------------------------------------------
# Public wrapper
# ---------------------------------------------------------------------------

def global_response_norm(x, gamma, beta, *, eps=DEFAULT_EPS, plan=None,
                         spatial_tile=None):
    """GRN forward.  x: (B, H, W, C); gamma, beta: (1, 1, 1, C)."""
    B, H, W, C = x.shape
    S = H * W
    eb = jnp.dtype(x.dtype).itemsize
    cap = _physical_vmem_bytes()
    ncores = _num_tensorcores()

    # Free layout change only: flatten (H, W) into one sublane axis; channels
    # stay lane-dense at their real extent (no HBM pad / slice passes).
    x3 = x.reshape(B, S, C)
    g2 = jnp.asarray(gamma, jnp.float32).reshape(1, C)
    b2 = jnp.asarray(beta, jnp.float32).reshape(1, C)

    f32_tmp = 2 * _block_vmem_bytes(min(_CHUNK_ROWS, S), C, jnp.float32)
    need_single = 4 * _block_vmem_bytes(S, C, x.dtype) + f32_tmp + (1 << 20)
    need_manual = _block_vmem_bytes(S, C, x.dtype) + f32_tmp + (1 << 20)

    if plan is None:
        if ncores > 1 and B < ncores and S * C * eb >= (4 << 20):
            # Multi-TensorCore chip at tiny batch: only the spatially tiled
            # two-pass keeps every core streaming HBM.
            plan = "two_pass"
        elif need_single <= int(cap * 0.8):
            plan = "single"      # 1 read + 1 write, double-buffered across B
        elif need_manual <= int(cap * 0.75):
            plan = "manual"      # 1 read + 1 write, single-buffered whole image
        else:
            plan = "two_pass"    # 2 reads + 1 write, spatially tiled

    if plan == "single":
        out3 = _single_pass(x3, g2, b2, eps=eps, cap=cap)
    elif plan == "manual":
        out3 = _manual_single_pass(x3, g2, b2, eps=eps, cap=cap)
    elif plan == "two_pass":
        out3 = _two_pass(x3, g2, b2, eps=eps, cap=cap, spatial_tile=spatial_tile)
    else:
        raise ValueError(f"unknown plan {plan!r}")

    return out3.reshape(B, H, W, C)


def _reference(x, gamma, beta, eps=DEFAULT_EPS):
    xf = x.astype(jnp.float32)
    gx = jnp.sqrt(jnp.sum(xf * xf, axis=(1, 2), keepdims=True))
    nx = gx / (jnp.mean(gx, axis=-1, keepdims=True) + eps)
    g = jnp.asarray(gamma, jnp.float32)
    b = jnp.asarray(beta, jnp.float32)
    return g * (xf * nx) + b + xf


if __name__ == "__main__":
    key = jax.random.PRNGKey(0)
    kx, kg, kb = jax.random.split(key, 3)

    # Shapes consistent with the module: NHWC input, (1, 1, 1, dim) parameters.
    B, H, W, C = 2, 16, 16, 32
    x = jax.random.normal(kx, (B, H, W, C), dtype=jnp.float32)
    # Module __init__ uses zeros; use small random values so GRN is exercised.
    gamma = 0.1 * jax.random.normal(kg, (1, 1, 1, C), dtype=jnp.float32)
    beta = 0.1 * jax.random.normal(kb, (1, 1, 1, C), dtype=jnp.float32)
    ref = _reference(x, gamma, beta)

    # Default plan (single-pass whole-image for this size).
    out = jax.block_until_ready(global_response_norm(x, gamma, beta))
    assert out.shape == x.shape and out.dtype == x.dtype
    assert jnp.allclose(out, ref, atol=1e-4, rtol=1e-4), "auto plan mismatch"

    # Force the other execution plans so every code path runs on-device.
    for p in ("manual", "two_pass"):
        o = jax.block_until_ready(
            global_response_norm(x, gamma, beta, plan=p, spatial_tile=64))
        assert jnp.allclose(o, ref, atol=1e-4, rtol=1e-4), f"{p} mismatch"

    # Ragged channels (C % 128 != 0) and a ragged last spatial tile.
    Br, Hr, Wr, Cr = 2, 5, 7, 13
    xr = jax.random.normal(kx, (Br, Hr, Wr, Cr), dtype=jnp.float32)
    gr = 0.1 * jax.random.normal(kg, (1, 1, 1, Cr), dtype=jnp.float32)
    br = 0.1 * jax.random.normal(kb, (1, 1, 1, Cr), dtype=jnp.float32)
    rr = _reference(xr, gr, br)
    for p in ("single", "manual", "two_pass"):
        o = jax.block_until_ready(
            global_response_norm(xr, gr, br, plan=p, spatial_tile=16))
        assert jnp.allclose(o, rr, atol=1e-4, rtol=1e-4), f"ragged {p} mismatch"

    # bf16 input: f32 accumulation + f32 apply, single rounding at the store.
    xb = x.astype(jnp.bfloat16)
    ob = jax.block_until_ready(global_response_norm(xb, gamma, beta))
    assert ob.dtype == jnp.bfloat16
    refb = _reference(xb.astype(jnp.float32), gamma, beta)
    assert jnp.allclose(ob.astype(jnp.float32), refb, atol=3e-2, rtol=3e-2), \
        "bf16 mismatch"

    print("KERNEL_OK")
</pallas_src>

<mosaic_0001>
module attributes {stable_mosaic.version = 11 : i64} {
  func.func @_grn_single_kernel(%arg0: i32, %arg1: memref<1x32xf32, #tpu.memory_space<vmem>>, %arg2: memref<1x32xf32, #tpu.memory_space<vmem>>, %arg3: memref<1x256x32xf32, #tpu.memory_space<vmem>>, %arg4: memref<1x256x32xf32, #tpu.memory_space<vmem>>) attributes {dimension_semantics = [#tpu.dimension_semantics<parallel>], iteration_bounds = array<i64: 2>, scalar_prefetch = 0 : i64, scratch_operands = 0 : i64, tpu.core_type = #tpu.core_type<tc>, window_params = [{pipeline_mode = #tpu.pipeline_mode<synchronous>, transform_indices = @transform_0, window_bounds = array<i64: 1, 32>}, {pipeline_mode = #tpu.pipeline_mode<synchronous>, transform_indices = @transform_1, window_bounds = array<i64: 1, 32>}, {transform_indices = @transform_2, window_bounds = array<i64: 1, 256, 32>}, {transform_indices = @transform_3, window_bounds = array<i64: 1, 256, 32>}]} {
    %c0 = arith.constant 0 : index
    %c0_0 = arith.constant 0 : index
    %c0_1 = arith.constant 0 : index
    %0 = vector.load %arg3[%c0, %c0_0, %c0_1] : memref<1x256x32xf32, #tpu.memory_space<vmem>>, vector<1x256x32xf32>
    %1 = vector.shape_cast %0 : vector<1x256x32xf32> to vector<256x32xf32>
    %2 = arith.mulf %1, %1 : vector<256x32xf32>
    %cst = arith.constant dense<0.000000e+00> : vector<32xf32>
    %3 = vector.multi_reduction <add>, %2, %cst [0] : vector<256x32xf32> to vector<32xf32>
    %4 = vector.shape_cast %3 : vector<32xf32> to vector<1x32xf32>
    %c0_2 = arith.constant 0 : index
    %c0_3 = arith.constant 0 : index
    %5 = vector.load %arg1[%c0_2, %c0_3] : memref<1x32xf32, #tpu.memory_space<vmem>>, vector<1x32xf32>
    %6 = math.sqrt %4 : vector<1x32xf32>
    %cst_4 = arith.constant dense<0.000000e+00> : vector<1xf32>
    %7 = vector.multi_reduction <add>, %6, %cst_4 [1] : vector<1x32xf32> to vector<1xf32>
    %8 = vector.shape_cast %7 : vector<1xf32> to vector<1x1xf32>
    %cst_5 = arith.constant 3.200000e+01 : f32
    %9 = vector.broadcast %cst_5 : f32 to vector<1x1xf32>
    %10 = arith.divf %8, %9 : vector<1x1xf32>
    %cst_6 = arith.constant 9.99999974E-6 : f32
    %11 = vector.broadcast %cst_6 : f32 to vector<1x1xf32>
    %12 = arith.addf %10, %11 : vector<1x1xf32>
    %13 = tpu.reciprocal %12 {approx = true} : vector<1x1xf32> -> vector<1x1xf32>
    %14 = arith.mulf %12, %13 : vector<1x1xf32>
    %cst_7 = arith.constant 2.000000e+00 : f32
    %15 = vector.broadcast %cst_7 : f32 to vector<1x1xf32>
    %16 = arith.subf %15, %14 : vector<1x1xf32>
    %17 = arith.mulf %13, %16 : vector<1x1xf32>
    %18 = vector.broadcast %17 : vector<1x1xf32> to vector<1x32xf32>
    %19 = arith.mulf %6, %18 : vector<1x32xf32>
    %20 = arith.mulf %5, %19 : vector<1x32xf32>
    %cst_8 = arith.constant 1.000000e+00 : f32
    %21 = vector.broadcast %cst_8 : f32 to vector<1x32xf32>
    %22 = arith.addf %20, %21 : vector<1x32xf32>
    %c0_9 = arith.constant 0 : index
    %c0_10 = arith.constant 0 : index
    %23 = vector.load %arg2[%c0_9, %c0_10] : memref<1x32xf32, #tpu.memory_space<vmem>>, vector<1x32xf32>
    %c0_11 = arith.constant 0 : index
    %c0_12 = arith.constant 0 : index
    %c0_13 = arith.constant 0 : index
    %24 = vector.load %arg3[%c0_11, %c0_12, %c0_13] : memref<1x256x32xf32, #tpu.memory_space<vmem>>, vector<1x256x32xf32>
    %25 = vector.shape_cast %24 : vector<1x256x32xf32> to vector<256x32xf32>
    %26 = vector.broadcast %22 : vector<1x32xf32> to vector<256x32xf32>
    %27 = arith.mulf %25, %26 : vector<256x32xf32>
    %28 = vector.broadcast %23 : vector<1x32xf32> to vector<256x32xf32>
    %29 = arith.addf %27, %28 : vector<256x32xf32>
    %c0_14 = arith.constant 0 : index
    %c0_15 = arith.constant 0 : index
    %c0_16 = arith.constant 0 : index
    %30 = vector.load %arg4[%c0_14, %c0_15, %c0_16] : memref<1x256x32xf32, #tpu.memory_space<vmem>>, vector<1x256x32xf32>
    %31 = vector.shape_cast %30 : vector<1x256x32xf32> to vector<256x32xf32>
    %32 = vector.shape_cast %29 : vector<256x32xf32> to vector<1x256x32xf32>
    tpu.vector_store %arg4[%c0_14, %c0_15, %c0_16], %32 {strides = array<i32>} : memref<1x256x32xf32, #tpu.memory_space<vmem>>, vector<1x256x32xf32>,
    return
  }
  func.func @transform_0(%arg0: i32) -> (i32, i32) {
    %c0_i32 = arith.constant 0 : i32
    %c0_i32_0 = arith.constant 0 : i32
    %c0_i32_1 = arith.constant 0 : i32
    return %c0_i32, %c0_i32_0 : i32, i32
  }
  func.func @transform_1(%arg0: i32) -> (i32, i32) {
    %c0_i32 = arith.constant 0 : i32
    %c0_i32_0 = arith.constant 0 : i32
    %c0_i32_1 = arith.constant 0 : i32
    return %c0_i32, %c0_i32_0 : i32, i32
  }
  func.func @transform_2(%arg0: i32) -> (i32, i32, i32) {
    %c0_i32 = arith.constant 0 : i32
    %c0_i32_0 = arith.constant 0 : i32
    %c0_i32_1 = arith.constant 0 : i32
    return %arg0, %c0_i32, %c0_i32_0 : i32, i32, i32
  }
  func.func @transform_3(%arg0: i32) -> (i32, i32, i32) {
    %c0_i32 = arith.constant 0 : i32
    %c0_i32_0 = arith.constant 0 : i32
    %c0_i32_1 = arith.constant 0 : i32
    return %arg0, %c0_i32, %c0_i32_0 : i32, i32, i32
  }
}

</mosaic_0001>

<bundles_post_ra>
// kernel: tpu_custom_call.1
= control target key start
LH: loop header
LB: loop body
LE: loop exit
PB: predicated region body
PF: predicated region fallthrough
CT: control target
= control target key end

     0   :  { %s544_s12 = smov 0   ;;  %s901_s0 = inlined_call_operand.vmem [shape: f32[1,32], index: 0, kind: input, shape index: {}]   ;;  %s902_s1 = inlined_call_operand.vmem [shape: f32[1,32], index: 1, kind: input, shape index: {}]   ;;  %s903_s2 = inlined_call_operand.vmem [shape: f32[2,256,32], index: 2, kind: input, shape index: {}]   ;;  %s904_s3 = inlined_call_operand.vmem [shape: f32[2,256,32], index: 3, kind: output, shape index: {}]  }
   0x1 LB: > { %s490_s13 = sadd.s32 4294967295, %s522_s12   ;;  %p494_p0 = scmp.ge.s32.totalorder %s522_s12, 1  ;;  %s522_s12 = sphi %s544_s12, %s13_s12  }
   0x2   : > { %p137_p1 = scmp.lt.s32.totalorder %s522_s12, 3 }
   0x4   : > { %p138_p2 = pnand %p494_p0, %p137_p1 }
   0x5   : > { %p161_p3 = scmp.lt.s32.totalorder (!%p138_p2), %s490_s13, 1  ;;  %vm235_vm0 = vcmask (!%p138_p2), 261120  }
   0x6   : > { %141 = sbr.rel (%p138_p2) target bundleno = 308 (0x134), region = 32 }
   0xd   : > { %s906_s13 = smov (!%p161_p3, %s490_s13), 1 }
   0xe   : > { %s502_s14 = sshll.u32 %s906_s13, 8 }
   0xf   : > { %s560_s17 = scalar_lea.vmem %s903_s2, %s502_s14  ;;  %s796_s24 = scalar_lea.vmem %s904_s3, %s502_s14 }
  0x10   : > { %v563_v0 = vld [vmem:[%s560_s17] sm:$0xff]  ;;  %v566_v1 = vld [vmem:[%s560_s17 + $0x8] sm:$0xff]  ;;  %v569_v2 = vld [vmem:[%s560_s17 + $0x10] sm:$0xff] }
  0x11   : > { %v572_v3 = vld [vmem:[%s560_s17 + $0x18] sm:$0xff]  ;;  %v203_v4 = vmul.f32 %v563_v0, %v563_v0  ;;  %v204_v5 = vmul.f32 %v566_v1, %v566_v1  ;;  %v205_v6 = vmul.f32 %v569_v2, %v569_v2  ;;  %v581_v7 = vld [vmem:[%s560_s17 + $0x20] sm:$0xff]  ;;  %v585_v9 = vld [vmem:[%s560_s17 + $0x28] sm:$0xff] }
  0x12   : > { %v206_v10 = vmul.f32 %v572_v3, %v572_v3  ;;  %v591_v12 = vld [vmem:[%s560_s17 + $0x30] sm:$0xff]  ;;  %v207_v14 = vmul.f32 %v581_v7, %v581_v7  ;;  %v597_v16 = vld [vmem:[%s560_s17 + $0x38] sm:$0xff]  ;;  %v208_v17 = vmul.f32 %v585_v9, %v585_v9  ;;  %v605_v21 = vld [vmem:[%s560_s17 + $0x40] sm:$0xff] }
  0x13   : > { %v236_v8 = vsel %vm235_vm0, %v203_v4, 0.0  ;;  %v237_v11 = vsel %vm235_vm0, %v204_v5, 0.0  ;;  %v239_v15 = vsel %vm235_vm0, %v205_v6, 0.0  ;;  %v209_v19 = vmul.f32 %v591_v12, %v591_v12  ;;  %v611_v25 = vld [vmem:[%s560_s17 + $0x48] sm:$0xff]  ;;  %v618_v30 = vld [vmem:[%s560_s17 + $0x50] sm:$0xff]  ;;  %v624_v34 = vld [vmem:[%s560_s17 + $0x58] sm:$0xff] }
  0x14   : > { %v238_v13 = vadd.f32 %v237_v11, %v236_v8  ;;  %v241_v20 = vsel %vm235_vm0, %v206_v10, 0.0  ;;  %v210_v23 = vmul.f32 %v597_v16, %v597_v16  ;;  %v243_v24 = vsel %vm235_vm0, %v207_v14, 0.0  ;;  %v630_v38 = vld [vmem:[%s560_s17 + $0x60] sm:$0xff]  ;;  %v636_v42 = vld [vmem:[%s560_s17 + $0x68] sm:$0xff]  ;;  %v642_v46 = vld [vmem:[%s560_s17 + $0x70] sm:$0xff] }
  0x15   : > { %v245_v27 = vsel %vm235_vm0, %v208_v17, 0.0  ;;  %v211_v28 = vmul.f32 %v605_v21, %v605_v21  ;;  %v247_v29 = vsel %vm235_vm0, %v209_v19, 0.0  ;;  %v212_v32 = vmul.f32 %v611_v25, %v611_v25  ;;  %v648_v50 = vld [vmem:[%s560_s17 + $0x78] sm:$0xff]  ;;  %v654_v54 = vld [vmem:[%s560_s17 + $0x80] sm:$0xff]  ;;  %v660_v58 = vld [vmem:[%s560_s17 + $0x88] sm:$0xff] }
  0x16   : > { %v240_v18 = vadd.f32 %v239_v15, %v238_v13  ;;  %v249_v33 = vsel %vm235_vm0, %v210_v23, 0.0  ;;  %v213_v36 = vmul.f32 %v618_v30, %v618_v30  ;;  %v214_v40 = vmul.f32 %v624_v34, %v624_v34  ;;  %v666_v62 = vld [vmem:[%s560_s17 + $0x90] sm:$0xff]  ;;  %v672_v6 = vld [vmem:[%s560_s17 + $0x98] sm:$0xff]  ;;  %v678_v13 = vld [vmem:[%s560_s17 + $0xa0] sm:$0xff] }
  0x17   : > { %v251_v37 = vsel %vm235_vm0, %v211_v28, 0.0  ;;  %v253_v41 = vsel %vm235_vm0, %v212_v32, 0.0  ;;  %v215_v44 = vmul.f32 %v630_v38, %v630_v38  ;;  %v216_v48 = vmul.f32 %v636_v42, %v636_v42  ;;  %v690_v23 = vld [vmem:[%s560_s17 + $0xb0] sm:$0xff]  ;;  %v696_v28 = vld [vmem:[%s560_s17 + $0xb8] sm:$0xff] }
  0x18   : > { %v242_v22 = vadd.f32 %v241_v20, %v240_v18  ;;  %v255_v45 = vsel %vm235_vm0, %v213_v36, 0.0  ;;  %v257_v49 = vsel %vm235_vm0, %v214_v40, 0.0  ;;  %v217_v52 = vmul.f32 %v642_v46, %v642_v46  ;;  %v684_v18 = vld [vmem:[%s560_s17 + $0xa8] sm:$0xff] }
  0x19   : > { %v259_v53 = vsel %vm235_vm0, %v215_v44, 0.0  ;;  %v218_v56 = vmul.f32 %v648_v50, %v648_v50  ;;  %v261_v57 = vsel %vm235_vm0, %v216_v48, 0.0  ;;  %v219_v60 = vmul.f32 %v654_v54, %v654_v54  ;;  %v714_v44 = vld [vmem:[%s560_s17 + $0xd0] sm:$0xff] }
  0x1a   : > { %v244_v26 = vadd.f32 %v243_v24, %v242_v22  ;;  %v263_v61 = vsel %vm235_vm0, %v217_v52, 0.0  ;;  %v220_v4 = vmul.f32 %v660_v58, %v660_v58  ;;  %v221_v10 = vmul.f32 %v666_v62, %v666_v62 }
  0x1b   : > { %v265_v5 = vsel %vm235_vm0, %v218_v56, 0.0  ;;  %v267_v11 = vsel %vm235_vm0, %v219_v60, 0.0  ;;  %v222_v15 = vmul.f32 %v672_v6, %v672_v6  ;;  %v223_v20 = vmul.f32 %v678_v13, %v678_v13  ;;  %v732_v60 = vld [vmem:[%s560_s17 + $0xe8] sm:$0xff] }
  0x1c   : > { %v246_v31 = vadd.f32 %v245_v27, %v244_v26  ;;  %v269_v17 = vsel %vm235_vm0, %v220_v4, 0.0  ;;  %v271_v22 = vsel %vm235_vm0, %v221_v10, 0.0  ;;  %v224_v26 = vmul.f32 %v684_v18, %v684_v18 }
  0x1d   : > { %v273_v27 = vsel %vm235_vm0, %v222_v15, 0.0  ;;  %v275_v32 = vsel %vm235_vm0, %v223_v20, 0.0  ;;  %v226_v36 = vmul.f32 %v696_v28, %v696_v28  ;;  %v229_v52 = vmul.f32 %v714_v44, %v714_v44 }
  0x1e   : > { %v248_v35 = vadd.f32 %v247_v29, %v246_v31  ;;  %v225_v31 = vmul.f32 %v690_v23, %v690_v23  ;;  %v232_v10 = vmul.f32 %v732_v60, %v732_v60 }
  0x1f   : > { %v281_v48 = vsel %vm235_vm0, %v226_v36, 0.0  ;;  %v287_v4 = vsel %vm235_vm0, %v229_v52, 0.0 }
  0x20   : > { %v250_v39 = vadd.f32 %v249_v33, %v248_v35  ;;  %v702_v33 = vld [vmem:[%s560_s17 + $0xc0] sm:$0xff] }
  0x22   : > { %v252_v43 = vadd.f32 %v251_v37, %v250_v39  ;;  %v277_v37 = vsel %vm235_vm0, %v224_v26, 0.0  ;;  %v708_v39 = vld [vmem:[%s560_s17 + $0xc8] sm:$0xff] }
  0x24   : > { %v254_v47 = vadd.f32 %v253_v41, %v252_v43  ;;  %v227_v41 = vmul.f32 %v702_v33, %v702_v33  ;;  %v279_v43 = vsel %vm235_vm0, %v225_v31, 0.0 }
  0x26   : > { %v256_v51 = vadd.f32 %v255_v45, %v254_v47  ;;  %v228_v47 = vmul.f32 %v708_v39, %v708_v39 }
  0x28   : > { %v258_v55 = vadd.f32 %v257_v49, %v256_v51  ;;  %v720_v49 = vld [vmem:[%s560_s17 + $0xd8] sm:$0xff] }
  0x2a   : > { %v260_v59 = vadd.f32 %v259_v53, %v258_v55  ;;  %v283_v53 = vsel %vm235_vm0, %v227_v41, 0.0  ;;  %v726_v55 = vld [vmem:[%s560_s17 + $0xe0] sm:$0xff] }
  0x2c   : > { %v262_v63 = vadd.f32 %v261_v57, %v260_v59  ;;  %v230_v57 = vmul.f32 %v720_v49, %v720_v49  ;;  %v285_v59 = vsel %vm235_vm0, %v228_v47, 0.0 }
  0x2e   : > { %v264_v8 = vadd.f32 %v263_v61, %v262_v63  ;;  %v231_v63 = vmul.f32 %v726_v55, %v726_v55 }
  0x30   : > { %v266_v14 = vadd.f32 %v265_v5, %v264_v8  ;;  %v738_v5 = vld [vmem:[%s560_s17 + $0xf0] sm:$0xff] }
  0x32   : > { %v268_v19 = vadd.f32 %v267_v11, %v266_v14  ;;  %v289_v11 = vsel %vm235_vm0, %v230_v57, 0.0  ;;  %v744_v14 = vld [vmem:[%s560_s17 + $0xf8] sm:$0xff] }
  0x34   : > { %v270_v24 = vadd.f32 %v269_v17, %v268_v19  ;;  %v233_v17 = vmul.f32 %v738_v5, %v738_v5  ;;  %v291_v19 = vsel %vm235_vm0, %v231_v63, 0.0 }
  0x36   : > { %v272_v29 = vadd.f32 %v271_v22, %v270_v24  ;;  %v234_v22 = vmul.f32 %v744_v14, %v744_v14  ;;  %v293_v24 = vsel %vm235_vm0, %v232_v10, 0.0 }
  0x38   : > { %v274_v35 = vadd.f32 %v273_v27, %v272_v29  ;;  %v295_v27 = vsel %vm235_vm0, %v233_v17, 0.0  ;;  %v297_v31 = vsel %vm235_vm0, %v234_v22, 0.0  ;;  %v305_v17 = vld [vmem:[%s901_s0] sm:$0x1] }
  0x3a   : > { %v276_v40 = vadd.f32 %v275_v32, %v274_v35 }
  0x3c   : > { %v278_v45 = vadd.f32 %v277_v37, %v276_v40 }
  0x3e   : > { %v280_v51 = vadd.f32 %v279_v43, %v278_v45 }
  0x40   : > { %v282_v56 = vadd.f32 %v281_v48, %v280_v51 }
  0x42   : > { %v284_v61 = vadd.f32 %v283_v53, %v282_v56 }
  0x44   : > { %v286_v8 = vadd.f32 %v285_v59, %v284_v61 }
  0x46   : > { %v288_v15 = vadd.f32 %v287_v4, %v286_v8  ;;  %v328_v8 = vlaneseq }
  0x48   : > { %v290_v20 = vadd.f32 %v289_v11, %v288_v15  ;;  %v329_v15 = vshrl.u32 %v328_v8, 7 }
  0x4a   : > { %v292_v26 = vadd.f32 %v291_v19, %v290_v20  ;;  %v330_v22 = vsub.s32 0, %v329_v15 }
  0x4c   : > { %v294_v29 = vadd.f32 %v293_v24, %v292_v26 }
  0x4e   : > { %v296_v32 = vadd.f32 %v295_v27, %v294_v29 }
  0x50   : > { %v298_v35 = vadd.f32 %v297_v31, %v296_v32 }
  0x52   : > { %v299_v36 = vrot.slane %v298_v35, 4 }
  0x54   : > { %v300_v37 = vadd.f32 %v299_v36, %v298_v35 }
  0x56   : > { %v301_v40 = vrot.slane %v300_v37, 2 }
  0x58   : > { %v302_v41 = vadd.f32 %v301_v40, %v300_v37 }
  0x5a   : > { %v303_v43 = vrot.slane %v302_v41, 1 }
  0x5c   : > { %v304_v45 = vadd.f32 %v303_v43, %v302_v41 }
  0x5e   : > { %512 = vrsqrt.f32 %v304_v45  ;;  %vm308_vm1 = vcmp.eq.f32.partialorder %v304_v45, inf  ;;  %v311_v48 = vand.u32 2147483648, %v304_v45  ;;  %vm310_vm2 = vcmp.eq.f32.partialorder %v304_v45, 0.0 }
  0x68   : > { %v513_v47 = vpop.eup %512 }
  0x69   : > { %v307_v51 = vmul.f32 %v513_v47, %v304_v45 }
  0x6b   : > { %v309_v52 = vsel %vm308_vm1, %v304_v45, %v307_v51 }
  0x6c   : > { %v312_v53 = vsel %vm310_vm2, %v311_v48, %v309_v52 }
  0x6d   : > { %v313_v56 = vsel %vm235_vm0, %v312_v53, 0.0 }
  0x6e   : > { %314 = vadd.xlane.f32.xlu0 %v313_v56 }
  0xfb   : > { %v315_v57 = vpop.xlane.xlu0 %314 }
  0xfc   : > { %v317_v59 = vmul.f32 0.03125, %v315_v57 }
  0xfe   : > { %v318_v61 = vadd.f32 1e-05, %v317_v59 }
 0x100   : > { %514 = vrcp.f32 %v318_v61 }
 0x10a   : > { %v515_v63 = vpop.eup %514 }
 0x10b   : > { %v320_v4 = vmul.f32 %v515_v63, %v318_v61 }
 0x10d   : > { %v321_v10 = vsub.f32 2.0, %v320_v4 }
 0x10f   : > { %v322_v11 = vmul.f32 %v515_v63, %v321_v10 }
 0x111   : > { %v323_v19 = vmul.f32 %v322_v11, %v312_v53 }
 0x113   : > { %v324_v20 = vmul.f32 %v323_v19, %v305_v17 }
 0x115   : > { %v325_v24 = vadd.f32 1.0, %v324_v20 }
 0x117   : > { %v331_v26 = vrot.slane %v325_v24, %v330_v22 }
 0x119   : > { %v333_v27 = vmul.f32 %v331_v26, %v563_v0  ;;  %v334_v29 = vmul.f32 %v331_v26, %v566_v1  ;;  %v335_v31 = vmul.f32 %v331_v26, %v569_v2  ;;  %v336_v32 = vmul.f32 %v331_v26, %v572_v3 }
 0x11a   : > { %v337_v35 = vmul.f32 %v331_v26, %v581_v7  ;;  %v338_v36 = vmul.f32 %v331_v26, %v585_v9  ;;  %v339_v37 = vmul.f32 %v331_v26, %v591_v12  ;;  %v340_v40 = vmul.f32 %v331_v26, %v597_v16 }
 0x11b   : > { %v341_v41 = vmul.f32 %v331_v26, %v605_v21  ;;  %v342_v43 = vmul.f32 %v331_v26, %v611_v25  ;;  %v343_v0 = vmul.f32 %v331_v26, %v618_v30  ;;  %v344_v1 = vmul.f32 %v331_v26, %v624_v34  ;;  %v781_v30 = vld [vmem:[%s902_s1] ss:$0 sm:$0xff] }
 0x11c   : > { %v345_v2 = vmul.f32 %v331_v26, %v630_v38  ;;  %v346_v3 = vmul.f32 %v331_v26, %v636_v42  ;;  %v347_v7 = vmul.f32 %v331_v26, %v642_v46  ;;  %v348_v9 = vmul.f32 %v331_v26, %v648_v50 }
 0x11d   : > { %v349_v12 = vmul.f32 %v331_v26, %v654_v54  ;;  %v350_v16 = vmul.f32 %v331_v26, %v660_v58  ;;  %v351_v21 = vmul.f32 %v331_v26, %v666_v62  ;;  %v352_v25 = vmul.f32 %v331_v26, %v672_v6 }
 0x11e   : > { %v353_v34 = vmul.f32 %v331_v26, %v678_v13  ;;  %v354_v38 = vmul.f32 %v331_v26, %v684_v18  ;;  %v355_v42 = vmul.f32 %v331_v26, %v690_v23  ;;  %v356_v46 = vmul.f32 %v331_v26, %v696_v28 }
 0x11f   : > { %v357_v50 = vmul.f32 %v331_v26, %v702_v33  ;;  %v358_v54 = vmul.f32 %v331_v26, %v708_v39  ;;  %v359_v58 = vmul.f32 %v331_v26, %v714_v44  ;;  %v360_v62 = vmul.f32 %v331_v26, %v720_v49 }
 0x120   : > { %v361_v6 = vmul.f32 %v331_v26, %v726_v55  ;;  %v362_v13 = vmul.f32 %v331_v26, %v732_v60  ;;  %v363_v18 = vmul.f32 %v331_v26, %v738_v5  ;;  %v364_v23 = vmul.f32 %v331_v26, %v744_v14 }
 0x121   : > { %v371_v28 = vadd.f32 %v781_v30, %v333_v27  ;;  %v372_v33 = vadd.f32 %v781_v30, %v334_v29  ;;  %v373_v39 = vadd.f32 %v781_v30, %v335_v31  ;;  %v374_v44 = vadd.f32 %v781_v30, %v336_v32 }
 0x122   : > { %v375_v49 = vadd.f32 %v781_v30, %v337_v35  ;;  %v376_v55 = vadd.f32 %v781_v30, %v338_v36  ;;  %v377_v60 = vadd.f32 %v781_v30, %v339_v37  ;;  %v378_v5 = vadd.f32 %v781_v30, %v340_v40 }
 0x123   : > { %v379_v14 = vadd.f32 %v781_v30, %v341_v41  ;;  %v380_v45 = vadd.f32 %v781_v30, %v342_v43  ;;  %v381_v47 = vadd.f32 %v781_v30, %v343_v0  ;;  %v382_v48 = vadd.f32 %v781_v30, %v344_v1  ;;  %403 = vst.msk [vmem:[%s796_s24] sm:$0xff] %vm235_vm0, %v371_v28 }
 0x124   : > { %404 = vst.msk [vmem:[%s796_s24 + $0x8] sm:$0xff] %vm235_vm0, %v372_v33  ;;  %405 = vst.msk [vmem:[%s796_s24 + $0x10] sm:$0xff] %vm235_vm0, %v373_v39  ;;  %v383_v51 = vadd.f32 %v781_v30, %v345_v2  ;;  %v384_v52 = vadd.f32 %v781_v30, %v346_v3  ;;  %v385_v53 = vadd.f32 %v781_v30, %v347_v7 }
 0x125   : > { %406 = vst.msk [vmem:[%s796_s24 + $0x18] sm:$0xff] %vm235_vm0, %v374_v44  ;;  %v386_v56 = vadd.f32 %v781_v30, %v348_v9  ;;  %407 = vst.msk [vmem:[%s796_s24 + $0x20] sm:$0xff] %vm235_vm0, %v375_v49  ;;  %v387_v57 = vadd.f32 %v781_v30, %v349_v12  ;;  %v388_v59 = vadd.f32 %v781_v30, %v350_v16 }
 0x126   : > { %408 = vst.msk [vmem:[%s796_s24 + $0x28] sm:$0xff] %vm235_vm0, %v376_v55  ;;  %409 = vst.msk [vmem:[%s796_s24 + $0x30] sm:$0xff] %vm235_vm0, %v377_v60  ;;  %v389_v61 = vadd.f32 %v781_v30, %v351_v21  ;;  %v390_v63 = vadd.f32 %v781_v30, %v352_v25  ;;  %v391_v4 = vadd.f32 %v781_v30, %v353_v34 }
 0x127   : > { %410 = vst.msk [vmem:[%s796_s24 + $0x38] sm:$0xff] %vm235_vm0, %v378_v5  ;;  %411 = vst.msk [vmem:[%s796_s24 + $0x40] sm:$0xff] %vm235_vm0, %v379_v14  ;;  %v392_v8 = vadd.f32 %v781_v30, %v354_v38  ;;  %v393_v10 = vadd.f32 %v781_v30, %v355_v42  ;;  %v394_v11 = vadd.f32 %v781_v30, %v356_v46 }
 0x128   : > { %412 = vst.msk [vmem:[%s796_s24 + $0x48] sm:$0xff] %vm235_vm0, %v380_v45  ;;  %413 = vst.msk [vmem:[%s796_s24 + $0x50] sm:$0xff] %vm235_vm0, %v381_v47  ;;  %v395_v15 = vadd.f32 %v781_v30, %v357_v50  ;;  %v396_v17 = vadd.f32 %v781_v30, %v358_v54  ;;  %v397_v19 = vadd.f32 %v781_v30, %v359_v58 }
 0x129   : > { %414 = vst.msk [vmem:[%s796_s24 + $0x58] sm:$0xff] %vm235_vm0, %v382_v48  ;;  %415 = vst.msk [vmem:[%s796_s24 + $0x60] sm:$0xff] %vm235_vm0, %v383_v51  ;;  %v398_v20 = vadd.f32 %v781_v30, %v360_v62  ;;  %v399_v22 = vadd.f32 %v781_v30, %v361_v6  ;;  %v400_v24 = vadd.f32 %v781_v30, %v362_v13 }
 0x12a   : > { %416 = vst.msk [vmem:[%s796_s24 + $0x68] sm:$0xff] %vm235_vm0, %v384_v52  ;;  %417 = vst.msk [vmem:[%s796_s24 + $0x70] sm:$0xff] %vm235_vm0, %v385_v53  ;;  %v401_v26 = vadd.f32 %v781_v30, %v363_v18  ;;  %v402_v27 = vadd.f32 %v781_v30, %v364_v23 }
 0x12b   : > { %418 = vst.msk [vmem:[%s796_s24 + $0x78] sm:$0xff] %vm235_vm0, %v386_v56  ;;  %419 = vst.msk [vmem:[%s796_s24 + $0x80] sm:$0xff] %vm235_vm0, %v387_v57 }
 0x12c   : > { %420 = vst.msk [vmem:[%s796_s24 + $0x88] sm:$0xff] %vm235_vm0, %v388_v59  ;;  %421 = vst.msk [vmem:[%s796_s24 + $0x90] sm:$0xff] %vm235_vm0, %v389_v61 }
 0x12d   : > { %422 = vst.msk [vmem:[%s796_s24 + $0x98] sm:$0xff] %vm235_vm0, %v390_v63  ;;  %423 = vst.msk [vmem:[%s796_s24 + $0xa0] sm:$0xff] %vm235_vm0, %v391_v4 }
 0x12e   : > { %424 = vst.msk [vmem:[%s796_s24 + $0xa8] sm:$0xff] %vm235_vm0, %v392_v8  ;;  %425 = vst.msk [vmem:[%s796_s24 + $0xb0] sm:$0xff] %vm235_vm0, %v393_v10 }
 0x12f   : > { %426 = vst.msk [vmem:[%s796_s24 + $0xb8] sm:$0xff] %vm235_vm0, %v394_v11  ;;  %427 = vst.msk [vmem:[%s796_s24 + $0xc0] sm:$0xff] %vm235_vm0, %v395_v15 }
 0x130   : > { %428 = vst.msk [vmem:[%s796_s24 + $0xc8] sm:$0xff] %vm235_vm0, %v396_v17  ;;  %429 = vst.msk [vmem:[%s796_s24 + $0xd0] sm:$0xff] %vm235_vm0, %v397_v19 }
 0x131   : > { %430 = vst.msk [vmem:[%s796_s24 + $0xd8] sm:$0xff] %vm235_vm0, %v398_v20  ;;  %431 = vst.msk [vmem:[%s796_s24 + $0xe0] sm:$0xff] %vm235_vm0, %v399_v22 }
 0x132   : > { %432 = vst.msk [vmem:[%s796_s24 + $0xe8] sm:$0xff] %vm235_vm0, %v400_v24  ;;  %433 = vst.msk [vmem:[%s796_s24 + $0xf0] sm:$0xff] %vm235_vm0, %v401_v26 }
 0x133   : > { %434 = vst.msk [vmem:[%s796_s24 + $0xf8] sm:$0xff] %vm235_vm0, %v402_v27 }
 0x134 PF: > { %s13_s12 = sadd.s32 1, %s522_s12  }
 0x135   : > { %p10_p4 = scmp.ge.s32.totalorder %s13_s12, 4  }
 0x137   :  { %12 = sbr.rel (!%p10_p4) target bundleno = 1 (0x1), region = 62 }

</bundles_post_ra>
